<compile_context>
chip_gen: v7x
topology: tpu7x:2x2x1
jax: 0.10.0
libtpu: 0.0.40
codegen_flags: <defaults>
</compile_context>

<pallas_src>
import jax
import jax.numpy as jnp
from jax.experimental import pallas as pl
from jax.experimental.pallas import tpu as pltpu


def _complex_wave_kernel(x_ref, o_ref):
    # x_ref: (tb, tc), o_ref: (tb, 2, tc)
    x = x_ref[...]
    o_ref[:, 0, :] = jnp.cos(x).astype(o_ref.dtype)
    o_ref[:, 1, :] = jnp.sin(x).astype(o_ref.dtype)


def _choose_tiles(B, CHW):
    """Pick (tb, tc) so the double-buffered working set stays well under VMEM."""
    # Column tile: lane-dense, multiple of 128 unless we take the full extent.
    MAX_TC = 32 * 1024
    if CHW <= MAX_TC or CHW % 128 != 0:
        tc = CHW                       # full extent on the column dim
    else:
        tc = MAX_TC                    # multiple of 128

    # Row tile: ~6 MiB per (in + out) tile set => ~12-16 MiB double buffered.
    target_bytes = 6 << 20
    tb = max(8, target_bytes // (12 * tc))
    tb = (tb // 8) * 8                 # sublane multiple
    if tb >= B:
        tb = B                         # full extent on the row dim
    return tb, tc


def complex_wave_pallas(x):
    """x: (B, C, H, W) float32 -> (B, 2C, H, W) float32, [cos(x); sin(x)] on dim 1."""
    B, C, H, W = x.shape
    CHW = C * H * W
    x2 = x.reshape(B, CHW)

    tb, tc = _choose_tiles(B, CHW)
    grid = (pl.cdiv(B, tb), pl.cdiv(CHW, tc))

    out = pl.pallas_call(
        _complex_wave_kernel,
        out_shape=jax.ShapeDtypeStruct((B, 2, CHW), jnp.float32),
        grid_spec=pltpu.PrefetchScalarGridSpec(
            num_scalar_prefetch=0,
            grid=grid,
            in_specs=[pl.BlockSpec((tb, tc), lambda i, j: (i, j))],
            out_specs=pl.BlockSpec((tb, 2, tc), lambda i, j: (i, 0, j)),
        ),
        compiler_params=pltpu.CompilerParams(
            dimension_semantics=("parallel", "parallel"),
            # Covers the ~12-16 MiB double-buffered working set on all of
            # v5e / v6e / v7x (raises v5e's 16 MiB default scoped limit,
            # stays well under v7x's 64 MiB physical VMEM).
            vmem_limit_bytes=32 << 20,
        ),
    )(x2)

    # Free contiguous reshape: (B, 2, C, H, W) -> (B, 2C, H, W); index 0 of the
    # "2" axis lands on channels [0:C] (cos / real), index 1 on [C:2C] (sin / imag).
    return out.reshape(B, 2 * C, H, W)


def _reference(x):
    # exp(i*x) = cos(x) + i*sin(x); concat [real, imag] along dim 1.
    return jnp.concatenate([jnp.cos(x), jnp.sin(x)], axis=1).astype(jnp.float32)


if __name__ == "__main__":
    key = jax.random.PRNGKey(0)
    x = jax.random.normal(key, (2, 4, 16, 16), dtype=jnp.float32)

    y = complex_wave_pallas(x)
    jax.block_until_ready(y)

    y_ref = _reference(x)
    assert y.shape == (2, 8, 16, 16), y.shape
    assert y.dtype == jnp.float32
    assert jnp.allclose(y, y_ref, atol=1e-5, rtol=1e-5)

    print("KERNEL_OK")
</pallas_src>

<mosaic_0001>
module attributes {stable_mosaic.version = 11 : i64} {
  func.func @_complex_wave_kernel(%arg0: i32, %arg1: i32, %arg2: memref<2x1024xf32, #tpu.memory_space<vmem>>, %arg3: memref<2x2x1024xf32, #tpu.memory_space<vmem>>) attributes {dimension_semantics = [#tpu.dimension_semantics<parallel>, #tpu.dimension_semantics<parallel>], iteration_bounds = array<i64: 1, 1>, scalar_prefetch = 0 : i64, scratch_operands = 0 : i64, tpu.core_type = #tpu.core_type<tc>, window_params = [{transform_indices = @transform_0, window_bounds = array<i64: 2, 1024>}, {transform_indices = @transform_1, window_bounds = array<i64: 2, 2, 1024>}]} {
    %c0 = arith.constant 0 : index
    %c0_0 = arith.constant 0 : index
    %0 = vector.load %arg2[%c0, %c0_0] : memref<2x1024xf32, #tpu.memory_space<vmem>>, vector<2x1024xf32>
    %1 = math.cos %0 : vector<2x1024xf32>
    %c0_1 = arith.constant 0 : index
    %c0_2 = arith.constant 0 : index
    %c0_3 = arith.constant 0 : index
    %2 = vector.load %arg3[%c0_1, %c0_2, %c0_3] : memref<2x2x1024xf32, #tpu.memory_space<vmem>>, vector<2x1x1024xf32>
    %3 = vector.shape_cast %2 : vector<2x1x1024xf32> to vector<2x1024xf32>
    %4 = vector.shape_cast %1 : vector<2x1024xf32> to vector<2x1x1024xf32>
    tpu.vector_store %arg3[%c0_1, %c0_2, %c0_3], %4 {strides = array<i32>} : memref<2x2x1024xf32, #tpu.memory_space<vmem>>, vector<2x1x1024xf32>,
    %5 = math.sin %0 : vector<2x1024xf32>
    %c0_4 = arith.constant 0 : index
    %c1 = arith.constant 1 : index
    %c0_5 = arith.constant 0 : index
    %6 = vector.load %arg3[%c0_4, %c1, %c0_5] : memref<2x2x1024xf32, #tpu.memory_space<vmem>>, vector<2x1x1024xf32>
    %7 = vector.shape_cast %6 : vector<2x1x1024xf32> to vector<2x1024xf32>
    %8 = vector.shape_cast %5 : vector<2x1024xf32> to vector<2x1x1024xf32>
    tpu.vector_store %arg3[%c0_4, %c1, %c0_5], %8 {strides = array<i32>} : memref<2x2x1024xf32, #tpu.memory_space<vmem>>, vector<2x1x1024xf32>,
    return
  }
  func.func @transform_0(%arg0: i32, %arg1: i32) -> (i32, i32) {
    %c0_i32 = arith.constant 0 : i32
    return %arg0, %arg1 : i32, i32
  }
  func.func @transform_1(%arg0: i32, %arg1: i32) -> (i32, i32, i32) {
    %c0_i32 = arith.constant 0 : i32
    %c0_i32_0 = arith.constant 0 : i32
    return %arg0, %c0_i32, %arg1 : i32, i32, i32
  }
}

</mosaic_0001>

<bundles_post_ra>
// kernel: tpu_custom_call.1
= control target key start
LH: loop header
LB: loop body
LE: loop exit
PB: predicated region body
PF: predicated region fallthrough
CT: control target
= control target key end

     0   :  { %6 = vsyncpa [#allocation3], 0  ;;  %s707_s0 = inlined_call_operand.hbm [shape: f32[2,1024], index: 0, kind: input, shape index: {}]   ;;  %s708_s1 = inlined_call_operand.hbm [shape: f32[2,2,1024], index: 1, kind: output, shape index: {}]  }
   0x1   :  { %7 = vsyncpa [#allocation4], 0  ;;  %s592_s6 = smov [#allocation2]   ;;  %s544_s10 = scalar_lea.hbm %s707_s0, 256 }
   0x2   :  { %s14_s7 = sshll.u32 %s592_s6, 4  ;;  %p545_p0 = scmp.ne.s32.totalorder %s707_s0, %s544_s10  ;;  %s15_s7 = int_to_ptr.vmem [resolvable:$true] %s14_s7 }
   0x3   :  { %p548_p1 = scmp.lt.u32.totalorder %s544_s10, %s707_s0 }
   0x5   :  { %p550_p2 = pnand %p548_p1, %p545_p0 }
   0x7   :  { %553 = shalt.err (!%p550_p2)
}
   0x8   :  { %s554_s15 = scalar_lea.vmem %s15_s7, 256  ;;  %p559_p4 = scmp.lt.s32.totalorder %s15_s7, %s15_s7 }
   0x9   :  { %p555_p3 = scmp.ne.s32.totalorder %s15_s7, %s554_s15  ;;  %p560_p5 = scmp.lt.s32.totalorder %s554_s15, %s554_s15 }
   0xb   :  { %p561_p6 = por %p560_p5, %p559_p4 }
   0xd   :  { %p562_p7 = pnand %p561_p6, %p555_p3 }
   0xf   :  { %565 = shalt.err (!%p562_p7)
}
  0x10   :  { %17 = dma.hbm_to_vmem [thread:$0]  %s707_s0, 256, %s15_s7, [#allocation3]  }
  0x11   :  { %588 = dma.done.wait [#allocation3], 256  }
  0x12   :  { %589 = vsyncadd [#allocation3], 4294967040  ;;  %v625_v0 = vld [vmem:[#allocation2] sm:$0xff]  ;;  %v627_v1 = vld [vmem:[#allocation2 + $0x8] sm:$0xff]  ;;  %v593_v24 = vmov 683565275  }
  0x13   :  { %v23_v2 = vand.u32 2147483647, %v625_v0  ;;  %v26_v3 = vand.u32 2139095040, %v625_v0  ;;  %v126_v4 = vand.u32 2147483647, %v627_v1  ;;  %v129_v5 = vand.u32 2139095040, %v627_v1 }
  0x14   :  { %v594_v26 = vmov 2475754826   ;;  %v595_v28 = vmov 2131351028   ;;  %v596_v30 = vmov 2102212464  }
  0x15   :  { %v27_v6 = vshrl.u32 %v26_v3, 23  ;;  %v30_v7 = vand.u32 8388607, %v23_v2  ;;  %v130_v8 = vshrl.u32 %v129_v5, 23  ;;  %v133_v9 = vand.u32 8388607, %v126_v4 }
  0x16   :  { %v597_v32 = vmov 920167782   ;;  %v598_v40 = vmov 1326507024   ;;  %vm25_vm14 = vcmp.lt.s32.totalorder %v625_v0, 0  ;;  %s600_s0 = smov [#allocation5]  }
  0x17   :  { %v501_v10 = vadd.s32 4294967169, %v27_v6  ;;  %v505_v11 = vadd.s32 4294967169, %v130_v8  ;;  %v31_v13 = vor.u32 8388608, %v30_v7  ;;  %v134_v14 = vor.u32 8388608, %v133_v9  ;;  %s489_s18 = sshll.u32 %s600_s0, 4  ;;  %s490_s18 = int_to_ptr.vmem [resolvable:$true] %s489_s18 }
  0x18   :  { %vm24_vm15 = vcmp.le.f32.partialorder %v23_v2, 0.7853982  ;;  %s566_s19 = scalar_lea.vmem %s490_s18, 512  ;;  %p571_p9 = scmp.lt.s32.totalorder %s490_s18, %s490_s18 }
  0x19   :  { %v33_v12 = vadd.s32 1, %v501_v10  ;;  %v136_v15 = vadd.s32 1, %v505_v11  ;;  %v637_v20 = vshll.u32 %v31_v13, 8  ;;  %v639_v22 = vshll.u32 %v134_v14, 8  ;;  %p567_p8 = scmp.ne.s32.totalorder %s490_s18, %s566_s19  ;;  %p572_p10 = scmp.lt.s32.totalorder %s566_s19, %s566_s19 }
  0x1b   :  { %vm34_vm0 = vcmp.gt.s32.totalorder %v33_v12, 0  ;;  %vm137_vm1 = vcmp.gt.s32.totalorder %v136_v15, 0  ;;  %p573_p11 = por %p572_p10, %p571_p9 }
  0x1c   :  { %v35_v16 = vsel %vm34_vm0, %v33_v12, 0  ;;  %v138_v19 = vsel %vm137_vm1, %v136_v15, 0  ;;  %vm128_vm0 = vcmp.lt.s32.totalorder %v627_v1, 0  ;;  %vm127_vm1 = vcmp.le.f32.partialorder %v126_v4, 0.7853982 }
  0x1d   :  { %v36_v17 = vshrl.u32 %v35_v16, 5  ;;  %v37_v18 = vand.u32 31, %v35_v16  ;;  %v140_v21 = vand.u32 31, %v138_v19  ;;  %v641_v34 = vshrl.u32 %v138_v19, 5  ;;  %p574_p12 = pnand %p573_p11, %p567_p8 }
  0x1f   :  { %v38_v23 = vsub.s32 32, %v37_v18  ;;  %v40_v25 = vshll.u32 %v593_v24, %v37_v18  ;;  %v43_v27 = vshll.u32 %v594_v26, %v37_v18  ;;  %v46_v29 = vshll.u32 %v595_v28, %v37_v18 }
  0x20   :  { %v49_v31 = vshll.u32 %v596_v30, %v37_v18  ;;  %v52_v33 = vshll.u32 %v597_v32, %v37_v18  ;;  %vm55_vm2 = vcmp.lt.s32.totalorder %v36_v17, 1  ;;  %vm56_vm3 = vcmp.lt.s32.totalorder %v36_v17, 2 }
  0x21   :  { %v39_v35 = vshrl.u32 %v593_v24, %v38_v23  ;;  %v41_v36 = vshrl.u32 %v594_v26, %v38_v23  ;;  %v44_v37 = vshrl.u32 %v595_v28, %v38_v23  ;;  %v47_v38 = vshrl.u32 %v596_v30, %v38_v23 }
  0x22   :  { %v50_v39 = vshrl.u32 %v597_v32, %v38_v23  ;;  %v53_v41 = vshrl.u32 %v598_v40, %v38_v23  ;;  %vm58_vm4 = vcmp.lt.s32.totalorder %v36_v17, 4  ;;  %v141_v45 = vsub.s32 32, %v140_v21 }
  0x23   :  { %v42_v42 = vor.u32 %v41_v36, %v40_v25  ;;  %v45_v43 = vor.u32 %v44_v37, %v43_v27  ;;  %v48_v44 = vor.u32 %v47_v38, %v46_v29  ;;  %vm57_vm5 = vcmp.lt.s32.totalorder %v36_v17, 3 }
  0x24   :  { %v51_v46 = vor.u32 %v50_v39, %v49_v31  ;;  %v54_v47 = vor.u32 %v53_v41, %v52_v33  ;;  %v143_v48 = vshll.u32 %v593_v24, %v140_v21  ;;  %v146_v56 = vshll.u32 %v594_v26, %v140_v21 }
  0x25   :  { %v59_v49 = vsel %vm55_vm2, %v39_v35, %v42_v42  ;;  %v60_v50 = vsel %vm58_vm4, %v48_v44, 2102212464  ;;  %v63_v51 = vsel %vm55_vm2, %v42_v42, %v45_v43  ;;  %v67_v52 = vsel %vm55_vm2, %v45_v43, %v48_v44 }
  0x26   :  { %v61_v53 = vsel %vm57_vm5, %v45_v43, %v60_v50  ;;  %v64_v54 = vsel %vm58_vm4, %v51_v46, 920167782  ;;  %v68_v55 = vsel %vm58_vm4, %v54_v47, 1326507024  ;;  %v142_v59 = vshrl.u32 %v593_v24, %v141_v45 }
  0x27   :  { %v65_v57 = vsel %vm57_vm5, %v48_v44, %v64_v54  ;;  %v69_v58 = vsel %vm57_vm5, %v51_v46, %v68_v55  ;;  %v144_v60 = vshrl.u32 %v594_v26, %v141_v45  ;;  %v62_v61 = vsel %vm56_vm3, %v59_v49, %v61_v53 }
  0x28   :  { %v66_v62 = vsel %vm56_vm3, %v63_v51, %v65_v57  ;;  %v70_v63 = vsel %vm56_vm3, %v67_v52, %v69_v58  ;;  %v147_v3 = vshrl.u32 %v595_v28, %v141_v45  ;;  %v149_v11 = vshll.u32 %v595_v28, %v140_v21 }
  0x29   :  { %v650_v5 = vmul.u32.u64.low %v637_v20, %v70_v63  ;;  %v651_v6 = vmul.u32.u64.high %v637_v20, %v70_v63, %v650_v5  ;;  %v654_v7 = vmul.u32.u64.low %v637_v20, %v66_v62  ;;  %v655_v8 = vmul.u32.u64.high %v637_v20, %v66_v62, %v654_v7 }
  0x2a   :  { %v145_v9 = vor.u32 %v144_v60, %v143_v48  ;;  %v148_v10 = vor.u32 %v147_v3, %v146_v56  ;;  %v150_v12 = vshrl.u32 %v596_v30, %v141_v45  ;;  %v152_v13 = vshll.u32 %v596_v30, %v140_v21 }
  0x2b   :  { %v153_v14 = vshrl.u32 %v597_v32, %v141_v45  ;;  %v155_v15 = vshll.u32 %v597_v32, %v140_v21  ;;  %v156_v16 = vshrl.u32 %v598_v40, %v141_v45  ;;  %v78_v17 = vmul.u32 %v637_v20, %v62_v61 }
  0x2c   :  { %v151_v18 = vor.u32 %v150_v12, %v149_v11  ;;  %vm158_vm6 = vcmp.lt.s32.totalorder %v641_v34, 1  ;;  %vm159_vm7 = vcmp.lt.s32.totalorder %v641_v34, 2  ;;  %vm80_vm8 = vc.u32 %v651_v6, %v654_v7 }
  0x2d   :  { %v81_v19 = vadd.s32 1, %v655_v8  ;;  %v154_v23 = vor.u32 %v153_v14, %v152_v13  ;;  %vm160_vm9 = vcmp.lt.s32.totalorder %v641_v34, 3  ;;  %v157_v24 = vor.u32 %v156_v16, %v155_v15 }
  0x2e   :  { %vm161_vm10 = vcmp.lt.s32.totalorder %v641_v34, 4  ;;  %v162_v25 = vsel %vm158_vm6, %v142_v59, %v145_v9  ;;  %v166_v21 = vsel %vm158_vm6, %v145_v9, %v148_v10  ;;  %v170_v28 = vsel %vm158_vm6, %v148_v10, %v151_v18 }
  0x2f   :  { %v82_v26 = vsel %vm80_vm8, %v81_v19, %v655_v8  ;;  %v163_v20 = vsel %vm161_vm10, %v151_v18, 2102212464  ;;  %v167_v27 = vsel %vm161_vm10, %v154_v23, 920167782  ;;  %v171_v32 = vsel %vm161_vm10, %v157_v24, 1326507024 }
  0x30   :  { %v83_v29 = vadd.s32 %v82_v26, %v78_v17  ;;  %v164_v30 = vsel %vm160_vm9, %v148_v10, %v163_v20  ;;  %v168_v31 = vsel %vm160_vm9, %v151_v18, %v167_v27  ;;  %v172_v36 = vsel %vm160_vm9, %v154_v23, %v171_v32 }
  0x31   :  { %v165_v33 = vsel %vm159_vm7, %v162_v25, %v164_v30  ;;  %v169_v35 = vsel %vm159_vm7, %v166_v21, %v168_v31  ;;  %v173_v38 = vsel %vm159_vm7, %v170_v28, %v172_v36  ;;  %v79_v57 = vadd.s32 %v654_v7, %v651_v6 }
  0x32   :  { %v84_v37 = vadd.s32 536870912, %v83_v29  ;;  %v672_v39 = vmul.u32.u64.low %v639_v22, %v169_v35  ;;  %v673_v40 = vmul.u32.u64.high %v639_v22, %v169_v35, %v672_v39  ;;  %v181_v44 = vmul.u32 %v639_v22, %v165_v33 }
  0x33   :  { %v676_v41 = vmul.u32.u64.low %v639_v22, %v173_v38  ;;  %v677_v42 = vmul.u32.u64.high %v639_v22, %v173_v38, %v676_v41  ;;  %vm115_vm8 = vweird.f32 %v625_v0 }
  0x34   :  { %v85_v43 = vshrl.u32 %v84_v37, 30  ;;  %v184_v46 = vadd.s32 1, %v673_v40 }
  0x35   :  { %vm183_vm11 = vc.u32 %v677_v42, %v672_v39  ;;  %v182_v13 = vadd.s32 %v672_v39, %v677_v42  ;;  %v599_v42 = vmov 1966171168  }
  0x36   :  { %v86_v45 = vshll.u32 %v85_v43, 30  ;;  %v185_v34 = vsel %vm183_vm11, %v184_v46, %v673_v40  ;;  %v109_v18 = vsub.s32 4, %v85_v43 }
  0x37   :  { %v186_v48 = vadd.s32 %v185_v34, %v181_v44  ;;  %v234_v44 = vlaneseq }
  0x38   :  { %v87_v47 = vsub.s32 %v83_v29, %v86_v45  ;;  %v110_v20 = vsel %vm25_vm14, %v109_v18, %v85_v43  ;;  %v232_v43 = vunpack.c.l.s4 %v599_v42 }
  0x39   :  { %v187_v50 = vadd.s32 536870912, %v186_v48  ;;  %v112_v31 = vsel %vm24_vm15, 0, %v110_v20 }
  0x3a   :  { %v89_v49 = vsub.s32 0, %v87_v47  ;;  %v345_v36 = vadd.s32 3, %v112_v31  ;;  %v116_v37 = vand.u32 3, %v112_v31  ;;  %v233_v4 = vunpack.c.0.s8 %v232_v43 }
  0x3b   :  { %v188_v52 = vshrl.u32 %v187_v50, 30 }
  0x3c   :  { %v502_v51 = vmin.u32 %v89_v49, %v87_v47  ;;  %v346_v41 = vand.u32 3, %v345_v36  ;;  %vm118_vm2 = vcmp.eq.s32.totalorder %v116_v37, 0  ;;  %vm121_vm3 = vcmp.eq.s32.totalorder %v116_v37, 2 }
  0x3d   :  { %v189_v54 = vshll.u32 %v188_v52, 30  ;;  %v212_v30 = vsub.s32 4, %v188_v52  ;;  %v235_v49 = vshrl.u32 %v234_v44, 7  ;;  %vm117_vm6 = vcmp.lt.s32.totalorder %v116_v37, 2 }
  0x3e   :  { %v91_v53 = vclz %v502_v51  ;;  %vm348_vm4 = vcmp.eq.s32.totalorder %v346_v41, 0  ;;  %vm351_vm5 = vcmp.eq.s32.totalorder %v346_v41, 2  ;;  %vm347_vm7 = vcmp.lt.s32.totalorder %v346_v41, 2 }
  0x3f   :  { %v190_v56 = vsub.s32 %v186_v48, %v189_v54  ;;  %v213_v35 = vsel %vm128_vm0, %v212_v30, %v188_v52 }
  0x40   :  { %v503_v55 = vadd.s32 4294967294, %v91_v53  ;;  %v215_v39 = vsel %vm127_vm1, 0, %v213_v35 }
  0x41   :  { %v192_v58 = vsub.s32 0, %v190_v56  ;;  %v449_v46 = vadd.s32 3, %v215_v39  ;;  %v219_v50 = vand.u32 3, %v215_v39 }
  0x42   :  { %vm504_vm12 = vcmp.lt.s32.totalorder %v503_v55, 0 }
  0x43   :  { %v94_v22 = vsel %vm504_vm12, 0, %v503_v55  ;;  %v506_v62 = vmin.u32 %v192_v58, %v190_v56  ;;  %v450_v51 = vand.u32 3, %v449_v46  ;;  %vm224_vm9 = vcmp.eq.s32.totalorder %v219_v50, 2 }
  0x44   :  { %v95_v59 = vsub.s32 32, %v94_v22  ;;  %v96_v60 = vshll.u32 %v87_v47, %v94_v22  ;;  %v99_v61 = vsub.s32 4294967266, %v94_v22  ;;  %v236_v58 = vsub.s32 %v233_v4, %v235_v49 }
  0x45   :  { %v194_v5 = vclz %v506_v62  ;;  %vm455_vm10 = vcmp.eq.s32.totalorder %v450_v51, 2  ;;  %vm220_vm11 = vcmp.lt.s32.totalorder %v219_v50, 2  ;;  %vm221_vm12 = vcmp.eq.s32.totalorder %v219_v50, 0 }
  0x46   :  { %v97_v63 = vshrl.u32 %v79_v57, %v95_v59  ;;  %v100_v3 = vadd.s32 127, %v99_v61 }
  0x47   :  { %v507_v10 = vadd.s32 4294967294, %v194_v5 }
  0x48   :  { %v98_v8 = vor.u32 %v97_v63, %v96_v60  ;;  %v101_v9 = vshll.u32 %v100_v3, 23 }
  0x49   :  { %vm508_vm13 = vcmp.lt.s32.totalorder %v507_v10, 0 }
  0x4a   :  { %v102_v11 = vor.u32 4788187, %v101_v9  ;;  %v105_v12 = vcvt.s32.f32 %v98_v8  ;;  %v197_v6 = vsel %vm508_vm13, 0, %v507_v10  ;;  %vm452_vm13 = vcmp.eq.s32.totalorder %v450_v51, 0 }
  0x4b   :  { %v198_v7 = vsub.s32 32, %v197_v6  ;;  %v199_v15 = vshll.u32 %v190_v56, %v197_v6  ;;  %v202_v16 = vsub.s32 4294967266, %v197_v6 }
  0x4c   :  { %v103_v14 = vand.u32 2147483647, %v102_v11 }
  0x4d   :  { %v200_v19 = vshrl.u32 %v182_v13, %v198_v7  ;;  %v203_v23 = vadd.s32 127, %v202_v16 }
  0x4e   :  { %v106_v17 = vmul.f32 %v105_v12, %v103_v14 }
  0x4f   :  { %v201_v25 = vor.u32 %v200_v19, %v199_v15  ;;  %v204_v21 = vshll.u32 %v203_v23, 23 }
  0x50   :  { %v107_v24 = vxor.u32 2147483648, %v106_v17 }
  0x51   :  { %v205_v28 = vor.u32 4788187, %v204_v21  ;;  %v208_v29 = vcvt.s32.f32 %v201_v25 }
  0x52   :  { %v108_v26 = vsel %vm25_vm14, %v107_v24, %v106_v17  ;;  %vm451_vm14 = vcmp.lt.s32.totalorder %v450_v51, 2 }
  0x53   :  { %v111_v27 = vsel %vm24_vm15, %v625_v0, %v108_v26  ;;  %v206_v32 = vand.u32 2147483647, %v205_v28  ;;  %vm218_vm15 = vweird.f32 %v627_v1 }
  0x54   :  { %536 = vcosq.f32 %v111_v27 }
  0x55   :  { %538 = vsinq.f32 %v111_v27  ;;  %v209_v33 = vmul.f32 %v208_v29, %v206_v32 }
  0x57   :  { %v210_v2 = vxor.u32 2147483648, %v209_v33 }
  0x59   :  { %v211_v38 = vsel %vm128_vm0, %v210_v2, %v209_v33 }
  0x5a   :  { %v214_v40 = vsel %vm127_vm1, %v627_v1, %v211_v38 }
  0x5b   :  { %540 = vcosq.f32 %v214_v40 }
  0x5c   :  { %542 = vsinq.f32 %v214_v40 }
  0x5e   :  { %v537_v45 = vpop.eup %536 }
  0x5f   :  { %v539_v47 = vpop.eup %538  ;;  %v122_v34 = vxor.u32 2147483648, %v537_v45 }
  0x60   :  { %v119_v48 = vxor.u32 2147483648, %v539_v47 }
  0x61   :  { %v123_v53 = vsel %vm121_vm3, %v122_v34, %v539_v47  ;;  %v353_v55 = vsel %vm351_vm5, %v122_v34, %v539_v47 }
  0x62   :  { %v120_v52 = vsel %vm118_vm2, %v537_v45, %v119_v48  ;;  %v350_v54 = vsel %vm348_vm4, %v537_v45, %v119_v48 }
  0x63   :  { %v124_v56 = vsel %vm117_vm6, %v120_v52, %v123_v53  ;;  %v354_v57 = vsel %vm347_vm7, %v350_v54, %v353_v55 }
  0x64   :  { %v125_v61 = vsel %vm115_vm8, nan, %v124_v56  ;;  %v355_v63 = vsel %vm115_vm8, nan, %v354_v57 }
  0x65   :  { %v541_v22 = vpop.eup %540  ;;  %v237_v10 = vrot.slane %v125_v61, %v236_v58  ;;  %v468_v12 = vrot.slane %v355_v63, %v236_v58 }
  0x66   :  { %v543_v59 = vpop.eup %542  ;;  %v225_v60 = vxor.u32 2147483648, %v541_v22 }
  0x67   :  { %v222_v62 = vxor.u32 2147483648, %v543_v59 }
  0x68   :  { %v226_v3 = vsel %vm224_vm9, %v225_v60, %v543_v59  ;;  %v457_v5 = vsel %vm455_vm10, %v225_v60, %v543_v59 }
  0x69   :  { %v223_v0 = vsel %vm221_vm12, %v541_v22, %v222_v62  ;;  %v454_v8 = vsel %vm452_vm13, %v541_v22, %v222_v62 }
  0x6a   :  { %v227_v9 = vsel %vm220_vm11, %v223_v0, %v226_v3  ;;  %v458_v11 = vsel %vm451_vm14, %v454_v8, %v457_v5 }
  0x6b   :  { %v228_v13 = vsel %vm218_vm15, nan, %v227_v9  ;;  %v459_v14 = vsel %vm218_vm15, nan, %v458_v11 }
  0x6c   :  { %v244_v6 = vrot.slane %v228_v13, %v236_v58  ;;  %v475_v7 = vrot.slane %v459_v14, %v236_v58 }
  0x6e   :  { %v245_v15 = vcombine.low %v237_v10, %v244_v6  ;;  %v246_v16 = vcombine.high %v237_v10, %v244_v6  ;;  %v476_v17 = vcombine.low %v468_v12, %v475_v7  ;;  %v477_v18 = vcombine.high %v468_v12, %v475_v7 }
  0x70   :  { %249 = vst [vmem:[#allocation5] ss:$2 sm:$0xff] %v245_v15  ;;  %251 = vst [vmem:[#allocation5 + $0x10] ss:$2 sm:$0xff] %v246_v16 }
  0x71   :  { %481 = vst [vmem:[#allocation5 + $0x1] ss:$2 sm:$0xff] %v476_v17  ;;  %483 = vst [vmem:[#allocation5 + $0x11] ss:$2 sm:$0xff] %v477_v18 }
  0x72   :  { %577 = shalt.err (!%p574_p12)
}
  0x73   :  { %s578_s22 = scalar_lea.hbm %s708_s1, 512 }
  0x74   :  { %p579_p13 = scmp.ne.s32.totalorder %s708_s1, %s578_s22  ;;  %p582_p0 = scmp.lt.u32.totalorder %s578_s22, %s708_s1 }
  0x76   :  { %p584_p1 = pnand %p582_p0, %p579_p13 }
  0x78   :  { %587 = shalt.err (!%p584_p1)
}
  0x79   :  { %s601_s27 = smov 256   ;;  %s602_s28 = smov 16  }
  0x7a   :  { %495 = dma.vmem_to_hbm [thread:$0]  %s490_s18, 512, %s708_s1, [#allocation4], %s601_s27, %s601_s27, %s602_s28  }
  0x7b   :  { %590 = dma.done.wait [#allocation4], 512  }
  0x7c   :  { %591 = vsyncadd [#allocation4], 4294966784 }
  0x7d   :  { %499 = vsyncpa [#allocation3], 1 }
  0x7e   :  { %500 = vsyncpa [#allocation4], 1 }

</bundles_post_ra>
